<compile_context>
chip_gen: v7x
topology: tpu7x:2x2x1
jax: 0.10.0
libtpu: 0.0.40
codegen_flags: <defaults>
</compile_context>

<pallas_src>
import functools

import numpy as np
import jax
import jax.numpy as jnp
from jax.experimental import pallas as pl
from jax.experimental.pallas import tpu as pltpu


# ----------------------------------------------------------------------------
# Host-side, deterministic construction of the normalized adjacency buffer
# (mirrors the PyTorch __init__; compute_adjacency_matrix_images uses the
# standard Gaussian-kernel-on-euclidean-distance definition).
# ----------------------------------------------------------------------------
def compute_adjacency_matrix_images(coord, sigma=0.1):
    coord = coord.reshape(-1, 2)
    dist = np.sqrt(((coord[:, None, :] - coord[None, :, :]) ** 2).sum(-1))
    adj = np.exp(-dist / (sigma * np.pi) ** 2)
    np.fill_diagonal(adj, 0.0)
    return adj


def build_normalized_adj(map_size, add_loop=True, improved=False):
    coord = np.zeros((map_size, map_size, 2), dtype=np.float64)
    for i in range(map_size):
        for j in range(map_size):
            coord[i, j, 0] = i + 1
            coord[i, j, 1] = j + 1
    adj = compute_adjacency_matrix_images(coord).astype(np.float32)   # (N, N)
    n = adj.shape[0]
    if add_loop:
        adj = adj.copy()
        adj[np.arange(n), np.arange(n)] = 1.0 if not improved else 2.0
    deg = adj.sum(axis=-1)
    deg_inv_sqrt = np.clip(deg, 1.0, None) ** -0.5
    adj = deg_inv_sqrt[:, None] * adj * deg_inv_sqrt[None, :]
    return jnp.asarray(adj, dtype=jnp.float32)                        # (N, N)


# ----------------------------------------------------------------------------
# Pallas kernel: ONE grid step per batch does the whole forward for that batch:
#   s = adj @ (x @ W) + b ; s = softmax over nodes ; pooled = sum_t s_t^T @ x_t
#   v = squash(pooled / n_classes)
# ----------------------------------------------------------------------------
def _pooling_kernel(x_ref, adj_ref, w_ref, b_ref, o_ref, *, n_classes):
    T, N, D = x_ref.shape          # (num_caps_types, nodes, output_dim)

    # Leading-dim collapse only (last dim unchanged, row blocks tile-aligned):
    # layout-compatible, no data movement.
    x_all = x_ref[...].reshape(T * N, D)                               # (T*N, D)

    # One batched MXU push for x @ W across ALL caps types.
    s_all = jnp.dot(x_all, w_ref[...], preferred_element_type=jnp.float32)  # (T*N, C)

    adj = adj_ref[...]                                                 # (N, N)
    bias = b_ref[...]                                                  # (1, C)

    # Per-caps-type graph propagation + node softmax.  T is a tiny static constant:
    # static Python unroll keeps every slice static and every op a plain 2-D op.
    p_parts = []
    for t in range(T):
        s_t = jnp.dot(adj, s_all[t * N:(t + 1) * N, :],
                      preferred_element_type=jnp.float32)              # (N, C)
        s_t = s_t + bias
        m = jnp.max(s_t, axis=0, keepdims=True)                        # softmax over nodes
        e = jnp.exp(s_t - m)
        denom = jnp.sum(e, axis=0, keepdims=True)
        p_parts.append(e * pl.reciprocal(denom))                       # EUP reciprocal
    p_all = jnp.concatenate(p_parts, axis=0)                           # (T*N, C)

    # pooled[c, d] = sum_{t,n} p[t*N+n, c] * x[t*N+n, d]
    #             == sum over caps types of s_t^T @ x_t, done as ONE MXU contraction.
    pooled = jax.lax.dot_general(
        p_all, x_all, dimension_numbers=(((0,), (0,)), ((), ())),
        preferred_element_type=jnp.float32)                            # (C, D)

    # PyTorch divides by u_predict.size()[2] == n_classes (module quirk kept).
    v = pooled * (1.0 / float(n_classes))
    # squash() epilogue: divides/sqrt routed to EUP (full precision).
    nsq = jnp.sum(v * v, axis=-1, keepdims=True)
    coef = nsq * pl.reciprocal(1.0 + nsq)
    o_ref[...] = coef * v * jax.lax.rsqrt(nsq + 1e-8)


def multi_head_graph_pooling(u_predict, adj, weight, bias, n_classes):
    B, T, N, D = u_predict.shape
    C = weight.shape[1]
    bias2d = bias.reshape(1, C)
    kernel = functools.partial(_pooling_kernel, n_classes=n_classes)
    # NOTE (v7x scaling): adj is N^2*4 bytes and VMEM-resident. At map_size >~ 45
    # (adj >= 16 MiB) pass pltpu.CompilerParams(vmem_limit_bytes=...) explicitly,
    # since v7x has only 64 MiB of physical VMEM (32 MiB default scoped limit).
    return pl.pallas_call(
        kernel,
        out_shape=jax.ShapeDtypeStruct((B, C, D), jnp.float32),
        grid_spec=pltpu.PrefetchScalarGridSpec(
            num_scalar_prefetch=0,
            grid=(B,),
            in_specs=[
                # Kernel sees (T, N, D): whole per-batch slab in one DMA.
                pl.BlockSpec((pl.Squeezed(), T, N, D), lambda b: (b, 0, 0, 0)),
                pl.BlockSpec((N, N), lambda b: (0, 0)),
                pl.BlockSpec((D, C), lambda b: (0, 0)),
                pl.BlockSpec((1, C), lambda b: (0, 0)),
            ],
            # Kernel sees (C, D); written exactly once per batch.
            out_specs=pl.BlockSpec((pl.Squeezed(), C, D), lambda b: (b, 0, 0)),
        ),
        # Batch axis parallel: v7x's two TensorCores each take one batch element;
        # harmless on single-TC v5e/v6e.
        compiler_params=pltpu.CompilerParams(
            dimension_semantics=("parallel",)),
    )(u_predict, adj, weight, bias2d)


# ----------------------------------------------------------------------------
# Pure-JAX reference (direct transcription of the PyTorch forward).
# ----------------------------------------------------------------------------
def reference(u_predict, adj, weight, bias, n_classes, output_dim):
    B, T, N, D = u_predict.shape
    x = u_predict.reshape(B * T, N, D)
    s = jnp.einsum('bnd,dc->bnc', x, weight)
    s = jnp.einsum('nm,bmc->bnc', adj, s)
    s = s + bias
    s = jax.nn.softmax(s, axis=1)
    x = jnp.einsum('bnc,bnd->bcd', s, x)
    u = x.reshape(B, -1, n_classes, output_dim)
    v = u.sum(axis=1) / n_classes
    nsq = jnp.sum(v * v, axis=-1, keepdims=True)
    return (nsq / (1.0 + nsq)) * v / jnp.sqrt(nsq + 1e-8)


if __name__ == "__main__":
    # Small, deterministic configuration.
    batch = 2
    num_caps_types = 4
    map_size = 4            # N = 16 nodes
    n_classes = 8
    output_dim = 32
    N = map_size * map_size

    key = jax.random.PRNGKey(0)
    k_w, k_x = jax.random.split(key)

    # Parameters (deterministic, synthetic): uniform(weight), zeros(bias).
    bound = 1.0 / np.sqrt(output_dim)
    weight = jax.random.uniform(k_w, (output_dim, n_classes),
                                minval=-bound, maxval=bound, dtype=jnp.float32)
    bias = jnp.zeros((n_classes,), dtype=jnp.float32)

    adj = build_normalized_adj(map_size, add_loop=True, improved=False)

    u_predict = jax.random.normal(
        k_x, (batch, num_caps_types, N, output_dim), dtype=jnp.float32)

    out = multi_head_graph_pooling(u_predict, adj, weight, bias, n_classes)
    out = jax.block_until_ready(out)

    ref = reference(u_predict, adj, weight, bias, n_classes, output_dim)
    np.testing.assert_allclose(np.asarray(out), np.asarray(ref), rtol=1e-5, atol=1e-5)

    print("KERNEL_OK")
</pallas_src>

<mosaic_0001>
module attributes {stable_mosaic.version = 11 : i64} {
  func.func @_pooling_kernel(%arg0: i32, %arg1: memref<1x4x16x32xf32, #tpu.memory_space<vmem>>, %arg2: memref<16x16xf32, #tpu.memory_space<vmem>>, %arg3: memref<32x8xf32, #tpu.memory_space<vmem>>, %arg4: memref<1x8xf32, #tpu.memory_space<vmem>>, %arg5: memref<1x8x32xf32, #tpu.memory_space<vmem>>) attributes {dimension_semantics = [#tpu.dimension_semantics<parallel>], iteration_bounds = array<i64: 2>, scalar_prefetch = 0 : i64, scratch_operands = 0 : i64, tpu.core_type = #tpu.core_type<tc>, window_params = [{transform_indices = @transform_0, window_bounds = array<i64: 1, 4, 16, 32>}, {pipeline_mode = #tpu.pipeline_mode<synchronous>, transform_indices = @transform_1, window_bounds = array<i64: 16, 16>}, {pipeline_mode = #tpu.pipeline_mode<synchronous>, transform_indices = @transform_2, window_bounds = array<i64: 32, 8>}, {pipeline_mode = #tpu.pipeline_mode<synchronous>, transform_indices = @transform_3, window_bounds = array<i64: 1, 8>}, {transform_indices = @transform_4, window_bounds = array<i64: 1, 8, 32>}]} {
    %c0 = arith.constant 0 : index
    %c0_0 = arith.constant 0 : index
    %c0_1 = arith.constant 0 : index
    %c0_2 = arith.constant 0 : index
    %0 = vector.load %arg1[%c0, %c0_0, %c0_1, %c0_2] : memref<1x4x16x32xf32, #tpu.memory_space<vmem>>, vector<1x4x16x32xf32>
    %1 = vector.shape_cast %0 : vector<1x4x16x32xf32> to vector<4x16x32xf32>
    %2 = vector.shape_cast %1 : vector<4x16x32xf32> to vector<64x32xf32>
    %c0_3 = arith.constant 0 : index
    %c0_4 = arith.constant 0 : index
    %3 = vector.load %arg3[%c0_3, %c0_4] : memref<32x8xf32, #tpu.memory_space<vmem>>, vector<32x8xf32>
    %cst = arith.constant dense<0.000000e+00> : vector<64x8xf32>
    %4 = tpu.matmul %2, %3, %cst {dimension_numbers = #tpu.dot_dimension_numbers<[1], [0], [0], [1], [0, 0, 1, 1], [], []>} : vector<64x32xf32>, vector<32x8xf32>, vector<64x8xf32> -> vector<64x8xf32>
    %c0_5 = arith.constant 0 : index
    %c0_6 = arith.constant 0 : index
    %5 = vector.load %arg2[%c0_5, %c0_6] : memref<16x16xf32, #tpu.memory_space<vmem>>, vector<16x16xf32>
    %c0_7 = arith.constant 0 : index
    %c0_8 = arith.constant 0 : index
    %6 = vector.load %arg4[%c0_7, %c0_8] : memref<1x8xf32, #tpu.memory_space<vmem>>, vector<1x8xf32>
    %7 = vector.extract_strided_slice %4 {offsets = [0, 0], sizes = [16, 8], strides = [1, 1]} : vector<64x8xf32> to vector<16x8xf32>
    %cst_9 = arith.constant dense<0.000000e+00> : vector<16x8xf32>
    %8 = tpu.matmul %5, %7, %cst_9 {dimension_numbers = #tpu.dot_dimension_numbers<[1], [0], [0], [1], [0, 0, 1, 1], [], []>} : vector<16x16xf32>, vector<16x8xf32>, vector<16x8xf32> -> vector<16x8xf32>
    %9 = vector.broadcast %6 : vector<1x8xf32> to vector<16x8xf32>
    %10 = arith.addf %8, %9 : vector<16x8xf32>
    %cst_10 = arith.constant dense<0xFF800000> : vector<8xf32>
    %11 = vector.multi_reduction <maximumf>, %10, %cst_10 [0] : vector<16x8xf32> to vector<8xf32>
    %12 = vector.shape_cast %11 : vector<8xf32> to vector<1x8xf32>
    %13 = vector.broadcast %12 : vector<1x8xf32> to vector<16x8xf32>
    %14 = arith.subf %10, %13 : vector<16x8xf32>
    %15 = math.exp %14 : vector<16x8xf32>
    %cst_11 = arith.constant dense<0.000000e+00> : vector<8xf32>
    %16 = vector.multi_reduction <add>, %15, %cst_11 [0] : vector<16x8xf32> to vector<8xf32>
    %17 = vector.shape_cast %16 : vector<8xf32> to vector<1x8xf32>
    %18 = tpu.reciprocal %17 : vector<1x8xf32> -> vector<1x8xf32>
    %19 = vector.broadcast %18 : vector<1x8xf32> to vector<16x8xf32>
    %20 = arith.mulf %15, %19 : vector<16x8xf32>
    %21 = vector.extract_strided_slice %4 {offsets = [16, 0], sizes = [16, 8], strides = [1, 1]} : vector<64x8xf32> to vector<16x8xf32>
    %cst_12 = arith.constant dense<0.000000e+00> : vector<16x8xf32>
    %22 = tpu.matmul %5, %21, %cst_12 {dimension_numbers = #tpu.dot_dimension_numbers<[1], [0], [0], [1], [0, 0, 1, 1], [], []>} : vector<16x16xf32>, vector<16x8xf32>, vector<16x8xf32> -> vector<16x8xf32>
    %23 = vector.broadcast %6 : vector<1x8xf32> to vector<16x8xf32>
    %24 = arith.addf %22, %23 : vector<16x8xf32>
    %cst_13 = arith.constant dense<0xFF800000> : vector<8xf32>
    %25 = vector.multi_reduction <maximumf>, %24, %cst_13 [0] : vector<16x8xf32> to vector<8xf32>
    %26 = vector.shape_cast %25 : vector<8xf32> to vector<1x8xf32>
    %27 = vector.broadcast %26 : vector<1x8xf32> to vector<16x8xf32>
    %28 = arith.subf %24, %27 : vector<16x8xf32>
    %29 = math.exp %28 : vector<16x8xf32>
    %cst_14 = arith.constant dense<0.000000e+00> : vector<8xf32>
    %30 = vector.multi_reduction <add>, %29, %cst_14 [0] : vector<16x8xf32> to vector<8xf32>
    %31 = vector.shape_cast %30 : vector<8xf32> to vector<1x8xf32>
    %32 = tpu.reciprocal %31 : vector<1x8xf32> -> vector<1x8xf32>
    %33 = vector.broadcast %32 : vector<1x8xf32> to vector<16x8xf32>
    %34 = arith.mulf %29, %33 : vector<16x8xf32>
    %35 = vector.extract_strided_slice %4 {offsets = [32, 0], sizes = [16, 8], strides = [1, 1]} : vector<64x8xf32> to vector<16x8xf32>
    %cst_15 = arith.constant dense<0.000000e+00> : vector<16x8xf32>
    %36 = tpu.matmul %5, %35, %cst_15 {dimension_numbers = #tpu.dot_dimension_numbers<[1], [0], [0], [1], [0, 0, 1, 1], [], []>} : vector<16x16xf32>, vector<16x8xf32>, vector<16x8xf32> -> vector<16x8xf32>
    %37 = vector.broadcast %6 : vector<1x8xf32> to vector<16x8xf32>
    %38 = arith.addf %36, %37 : vector<16x8xf32>
    %cst_16 = arith.constant dense<0xFF800000> : vector<8xf32>
    %39 = vector.multi_reduction <maximumf>, %38, %cst_16 [0] : vector<16x8xf32> to vector<8xf32>
    %40 = vector.shape_cast %39 : vector<8xf32> to vector<1x8xf32>
    %41 = vector.broadcast %40 : vector<1x8xf32> to vector<16x8xf32>
    %42 = arith.subf %38, %41 : vector<16x8xf32>
    %43 = math.exp %42 : vector<16x8xf32>
    %cst_17 = arith.constant dense<0.000000e+00> : vector<8xf32>
    %44 = vector.multi_reduction <add>, %43, %cst_17 [0] : vector<16x8xf32> to vector<8xf32>
    %45 = vector.shape_cast %44 : vector<8xf32> to vector<1x8xf32>
    %46 = tpu.reciprocal %45 : vector<1x8xf32> -> vector<1x8xf32>
    %47 = vector.broadcast %46 : vector<1x8xf32> to vector<16x8xf32>
    %48 = arith.mulf %43, %47 : vector<16x8xf32>
    %49 = vector.extract_strided_slice %4 {offsets = [48, 0], sizes = [16, 8], strides = [1, 1]} : vector<64x8xf32> to vector<16x8xf32>
    %cst_18 = arith.constant dense<0.000000e+00> : vector<16x8xf32>
    %50 = tpu.matmul %5, %49, %cst_18 {dimension_numbers = #tpu.dot_dimension_numbers<[1], [0], [0], [1], [0, 0, 1, 1], [], []>} : vector<16x16xf32>, vector<16x8xf32>, vector<16x8xf32> -> vector<16x8xf32>
    %51 = vector.broadcast %6 : vector<1x8xf32> to vector<16x8xf32>
    %52 = arith.addf %50, %51 : vector<16x8xf32>
    %cst_19 = arith.constant dense<0xFF800000> : vector<8xf32>
    %53 = vector.multi_reduction <maximumf>, %52, %cst_19 [0] : vector<16x8xf32> to vector<8xf32>
    %54 = vector.shape_cast %53 : vector<8xf32> to vector<1x8xf32>
    %55 = vector.broadcast %54 : vector<1x8xf32> to vector<16x8xf32>
    %56 = arith.subf %52, %55 : vector<16x8xf32>
    %57 = math.exp %56 : vector<16x8xf32>
    %cst_20 = arith.constant dense<0.000000e+00> : vector<8xf32>
    %58 = vector.multi_reduction <add>, %57, %cst_20 [0] : vector<16x8xf32> to vector<8xf32>
    %59 = vector.shape_cast %58 : vector<8xf32> to vector<1x8xf32>
    %60 = tpu.reciprocal %59 : vector<1x8xf32> -> vector<1x8xf32>
    %61 = vector.broadcast %60 : vector<1x8xf32> to vector<16x8xf32>
    %62 = arith.mulf %57, %61 : vector<16x8xf32>
    %63 = tpu.concatenate %20, %34, %48, %62 in 0 : vector<16x8xf32>, vector<16x8xf32>, vector<16x8xf32>, vector<16x8xf32> -> vector<64x8xf32>
    %cst_21 = arith.constant dense<0.000000e+00> : vector<8x32xf32>
    %64 = tpu.matmul %63, %2, %cst_21 {dimension_numbers = #tpu.dot_dimension_numbers<[0], [0], [1], [1], [0, 1, 1, 1], [], []>} : vector<64x8xf32>, vector<64x32xf32>, vector<8x32xf32> -> vector<8x32xf32>
    %cst_22 = arith.constant 1.250000e-01 : f32
    %65 = vector.broadcast %cst_22 : f32 to vector<8x32xf32>
    %66 = arith.mulf %64, %65 : vector<8x32xf32>
    %67 = arith.mulf %66, %66 : vector<8x32xf32>
    %cst_23 = arith.constant dense<0.000000e+00> : vector<8xf32>
    %68 = vector.multi_reduction <add>, %67, %cst_23 [1] : vector<8x32xf32> to vector<8xf32>
    %69 = vector.shape_cast %68 : vector<8xf32> to vector<8x1xf32>
    %cst_24 = arith.constant 1.000000e+00 : f32
    %70 = vector.broadcast %cst_24 : f32 to vector<8x1xf32>
    %71 = arith.addf %70, %69 : vector<8x1xf32>
    %72 = tpu.reciprocal %71 : vector<8x1xf32> -> vector<8x1xf32>
    %73 = arith.mulf %69, %72 : vector<8x1xf32>
    %74 = vector.broadcast %73 : vector<8x1xf32> to vector<8x32xf32>
    %75 = arith.mulf %74, %66 : vector<8x32xf32>
    %cst_25 = arith.constant 9.99999993E-9 : f32
    %76 = vector.broadcast %cst_25 : f32 to vector<8x1xf32>
    %77 = arith.addf %69, %76 : vector<8x1xf32>
    %78 = math.rsqrt %77 : vector<8x1xf32>
    %79 = vector.broadcast %78 : vector<8x1xf32> to vector<8x32xf32>
    %80 = arith.mulf %75, %79 : vector<8x32xf32>
    %c0_26 = arith.constant 0 : index
    %c0_27 = arith.constant 0 : index
    %c0_28 = arith.constant 0 : index
    %81 = vector.load %arg5[%c0_26, %c0_27, %c0_28] : memref<1x8x32xf32, #tpu.memory_space<vmem>>, vector<1x8x32xf32>
    %82 = vector.shape_cast %81 : vector<1x8x32xf32> to vector<8x32xf32>
    %83 = vector.shape_cast %80 : vector<8x32xf32> to vector<1x8x32xf32>
    tpu.vector_store %arg5[%c0_26, %c0_27, %c0_28], %83 {strides = array<i32>} : memref<1x8x32xf32, #tpu.memory_space<vmem>>, vector<1x8x32xf32>,
    return
  }
  func.func @transform_0(%arg0: i32) -> (i32, i32, i32, i32) {
    %c0_i32 = arith.constant 0 : i32
    %c0_i32_0 = arith.constant 0 : i32
    %c0_i32_1 = arith.constant 0 : i32
    %c0_i32_2 = arith.constant 0 : i32
    return %arg0, %c0_i32, %c0_i32_0, %c0_i32_1 : i32, i32, i32, i32
  }
  func.func @transform_1(%arg0: i32) -> (i32, i32) {
    %c0_i32 = arith.constant 0 : i32
    %c0_i32_0 = arith.constant 0 : i32
    %c0_i32_1 = arith.constant 0 : i32
    return %c0_i32, %c0_i32_0 : i32, i32
  }
  func.func @transform_2(%arg0: i32) -> (i32, i32) {
    %c0_i32 = arith.constant 0 : i32
    %c0_i32_0 = arith.constant 0 : i32
    %c0_i32_1 = arith.constant 0 : i32
    return %c0_i32, %c0_i32_0 : i32, i32
  }
  func.func @transform_3(%arg0: i32) -> (i32, i32) {
    %c0_i32 = arith.constant 0 : i32
    %c0_i32_0 = arith.constant 0 : i32
    %c0_i32_1 = arith.constant 0 : i32
    return %c0_i32, %c0_i32_0 : i32, i32
  }
  func.func @transform_4(%arg0: i32) -> (i32, i32, i32) {
    %c0_i32 = arith.constant 0 : i32
    %c0_i32_0 = arith.constant 0 : i32
    %c0_i32_1 = arith.constant 0 : i32
    return %arg0, %c0_i32, %c0_i32_0 : i32, i32, i32
  }
}

</mosaic_0001>

<bundles_post_ra>
// kernel: tpu_custom_call.1
= control target key start
LH: loop header
LB: loop body
LE: loop exit
PB: predicated region body
PF: predicated region fallthrough
CT: control target
= control target key end

     0   :  { %9 = vsyncpa [#allocation3], 0  ;;  %s1583_s0 = inlined_call_operand.hbm [shape: f32[2,4,16,32], index: 0, kind: input, shape index: {}]   ;;  %s1584_s1 = inlined_call_operand.vmem [shape: f32[16,16], index: 1, kind: input, shape index: {}]   ;;  %s1585_s2 = inlined_call_operand.vmem [shape: f32[32,8], index: 2, kind: input, shape index: {}]   ;;  %s1586_s3 = inlined_call_operand.vmem [shape: f32[1,8], index: 3, kind: input, shape index: {}]   ;;  %s1587_s4 = inlined_call_operand.hbm [shape: f32[2,8,32], index: 4, kind: output, shape index: {}]  }
   0x1   :  { %11 = vsyncpa [#allocation3 + $0x1], 0 }
   0x2   :  { %12 = vsyncpa [#allocation4], 0 }
   0x3   :  { %14 = vsyncpa [#allocation4 + $0x1], 0  ;;  %s1367_s15 = smov 0   ;;  %s1369_s16 = smov 0  }
   0x4   :  { %s1371_s17 = smov 0   ;;  %s1373_s18 = smov 0  }
   0x5 LB: > { %s1388_s19 = sadd.s32 4294967295, %s1333_s18   ;;  %s986_s20 = sadd.s32 4294967294, %s1333_s18   ;;  %s1333_s18 = sphi %s1373_s18, %s1600_s18   ;;  %s1329_s17 = sphi %s1371_s17, %s1599_s17   ;;  %s1325_s16 = sphi %s1369_s16, %s1598_s16   ;;  %s1321_s15 = sphi %s1367_s15, %s1597_s15  }
   0x6   : > { %s1392_s21 = sadd.s32 1, %s1333_s18   ;;  %s27_s22 = sadd.s32 1, %s1329_s17 }
   0x7   : > { %s24_s23 = ssub.s32 %s1333_s18, %s1392_s21  ;;  %p34_p0 = scmp.ne.s32.totalorder %s1329_s17, %s1325_s16 }
   0x8   : > { %p25_p1 = scmp.eq.s32.totalorder %s24_s23, 0  ;;  %p35_p2 = scmp.eq.s32.totalorder %s1333_s18, 0 }
   0x9   : > { %p40_p3 = scmp.ne.s32.totalorder %s1325_s16, %s1321_s15  ;;  %p41_p4 = scmp.eq.s32.totalorder %s1388_s19, 0 }
   0xa   : > { %s1404_s24 = scalar_select %p25_p1, %s1329_s17, %s27_s22  }
   0xb   : > { %p1406_p5 = por %p35_p2, %p34_p0  ;;  %p1410_p6 = por %p41_p4, %p40_p3 }
   0xc   : > { %p127_p7 = scmp.eq.s32.totalorder %s1388_s19, 1  ;;  %p133_p8 = scmp.eq.s32.totalorder %s986_s20, 1 }
   0xd   : > { %p1170_p10 = scmp.lt.s32.totalorder %s1333_s18, 2  ;;  %s162_s29 = sand.u32 1, %s1329_s17  }
   0xe   : > { %p1417_p11 = por %p127_p7, %p34_p0  ;;  %p1421_p12 = por %p133_p8, %p40_p3 }
   0xf   : > { %s1017_s30 = sshll.u32 %s1333_s18, 10  ;;  %s989_s5 = sshll.u32 %s162_s29, 6 }
  0x10   : > { %s1591_s27 = scalar_select %p1417_p11, 1, 0 }
  0x11   : > { %s1592_s28 = scalar_select %p1421_p12, 1, 0 }
  0x12   : > { %s1430_s8 = scalar_lea.hbm %s1583_s0, %s1017_s30  ;;  %s166_s9 = scalar_lea.vmem [#allocation2], %s989_s5 }
  0x13   : > { %s173_s10 = sshll.u32 %s166_s9, 4  ;;  %p1434_p13 = pnand %p1170_p10, %p1406_p5  ;;  %s1438_s10 = int_to_ptr.vmem [resolvable:$true] %s173_s10 }
  0x14   : > { %s1440_s12 = scalar_lea.sflag [#allocation3], %s162_s29  ;;  %s1237_s13 = scalar_lea.hbm %s1430_s8, 1024 }
  0x15   : > { %p1238_p0 = scmp.ne.s32.totalorder %s1430_s8, %s1237_s13  ;;  %p1239_p1 = pneg %p1434_p13 }
  0x16   : > { %s1242_s22 = scalar_lea.hbm %s1583_s0, 2048  ;;  %p1243_p4 = scmp.lt.u32.totalorder %s1430_s8, %s1583_s0 }
  0x17   : > { %p1240_p2 = pnand %p1239_p1, %p1238_p0  ;;  %p1244_p5 = scmp.lt.u32.totalorder %s1242_s22, %s1237_s13 }
  0x18   : > { %p1246_p8 = scmp.lt.u32.totalorder %s1237_s13, %s1430_s8 }
  0x19   : > { %p1241_p3 = pneg %p1240_p2  ;;  %p1245_p7 = por %p1244_p5, %p1243_p4 }
  0x1b   : > { %p1247_p10 = por %p1246_p8, %p1245_p7 }
  0x1d   : > { %p1248_p9 = pnand %p1247_p10, %p1241_p3 }
  0x1f   : > { %1251 = shalt.err (!%p1248_p9)
}
  0x20   : > { %s1252_s29 = scalar_lea.vmem %s1438_s10, 1024  ;;  %s1335_s30 = smov [#allocation2]  }
  0x21   : > { %p1253_p0 = scmp.ne.s32.totalorder %s1438_s10, %s1252_s29  ;;  %s1257_s5 = sshll.u32 %s1335_s30, 4  ;;  %s1258_s5 = int_to_ptr.vmem [resolvable:$false] %s1257_s5 }
  0x22   : > { %s1259_s6 = scalar_lea.vmem %s1258_s5, 2048  ;;  %p1260_p11 = scmp.lt.s32.totalorder %s1438_s10, %s1258_s5 }
  0x23   : > { %p1255_p2 = pnand %p1253_p0, %p1239_p1  ;;  %p1261_p4 = scmp.lt.s32.totalorder %s1259_s6, %s1252_s29 }
  0x25   : > { %p1256_p12 = pneg %p1255_p2  ;;  %p1262_p5 = por %p1261_p4, %p1260_p11 }
  0x27   : > { %p1263_p7 = pnand %p1262_p5, %p1256_p12 }
  0x29   : > { %1266 = shalt.err (!%p1263_p7)
}
  0x2a   : > { %s1336_s7 = smov 128   ;;  %s1337_s9 = smov 8  }
  0x2b   : > { %1165 = dma.hbm_to_vmem [thread:$0]  (!%p1434_p13), %s1430_s8, 1024, %s1438_s10, %s1440_s12, %s1336_s7, %s1336_s7, %s1337_s9  }
  0x2c   : > { %p992_p9 = scmp.ge.s32.totalorder %s1333_s18, 1  ;;  %p181_p1 = scmp.lt.s32.totalorder %s1333_s18, 3 }
  0x2e   : > { %p182_p3 = pnand %p992_p9, %p181_p1 }
  0x2f   : > { %s1471_s13 = sand.u32 (!%p182_p3), 1, %s1325_s16  }
  0x30   : > { %185 = sbr.rel (%p182_p3) target bundleno = 1081 (0x439), region = 36  ;;  %s993_s14 = sshll.u32 (!%p182_p3), %s1471_s13, 6 }
  0x31   : > { %s188_s20 = scalar_lea.sflag (!%p182_p3), [#allocation3], %s1471_s13  ;;  %s191_s22 = scalar_lea.vmem (!%p182_p3), [#allocation2], %s993_s14 }
  0x37   : > { %1312 = dma.done.wait (%p1410_p6), %s188_s20, 1024  }
  0x38   : > { %1314 = vsyncadd (%p1410_p6), %s188_s20, 4294966272  ;;  %vm228_vm0 = vcmask 261120   ;;  %v224_v0 = vld [vmem:[%s1585_s2] sm:$0xff]  ;;  %v225_v1 = vld [vmem:[%s1585_s2 + $0x8] sm:$0xff]  ;;  %vm367_vm1 = vcmask 130048   ;;  %v1338_v32 = vmov 0.0|0.0  }
  0x39   : > { %v226_v2 = vld [vmem:[%s1585_s2 + $0x10] sm:$0xff]  ;;  %v1122_v3 = vpack.c.bf16 %v225_v1, %v224_v0  ;;  %v227_v4 = vld [vmem:[%s1585_s2 + $0x18] sm:$0xff]  ;;  %v216_v5 = vld [vmem:[%s191_s22] sm:$0xff]  ;;  %vm1339_vm2 = vmmov 0   ;;  %v1340_v33 = vmov 0.0   ;;  %vm449_vm3 = vcmask 64512  }
  0x3a   : > { %v217_v6 = vld [vmem:[%s191_s22 + $0x8] sm:$0xff]  ;;  %v1126_v7 = vpack.c.bf16 %v227_v4, %v226_v2  ;;  %1063 = vmatprep.mubr.msk.f32.mxu0 %vm228_vm0, %v216_v5  ;;  %v218_v9 = vld [vmem:[%s191_s22 + $0x10] sm:$0xff]  ;;  %v219_v10 = vld [vmem:[%s191_s22 + $0x18] sm:$0xff]  ;;  %vm815_vm4 = vcmask 523264   ;;  %s994_s20 = sshll.u32 %s1471_s13, 3  ;;  %s903_s25 = scalar_lea.sflag [#allocation4], %s1471_s13 }
  0x3b   : > { %v1147_v8 = vpack.c.bf16 %v217_v6, %v216_v5  ;;  %v220_v11 = vld [vmem:[%s191_s22 + $0x20] sm:$0xff]  ;;  %1123 = vmatprep.subr.bf16.mxu0 %v1122_v3  ;;  %v1150_v12 = vpack.c.bf16 %v219_v10, %v218_v9  ;;  %v221_v13 = vld [vmem:[%s191_s22 + $0x28] sm:$0xff]  ;;  %v222_v14 = vld [vmem:[%s191_s22 + $0x30] sm:$0xff]  ;;  %s215_s8 = scalar_lea.vmem [#allocation5], %s994_s20  ;;  %p1594_p11 = scmp.ne.s32.totalorder %s1591_s27, 0 }
  0x3c   : > { %v223_v15 = vld [vmem:[%s191_s22 + $0x38] sm:$0xff]  ;;  %1125 = vmatpush3.bf16.msra.mxu0 %v1122_v3  ;;  %v1153_v16 = vpack.c.bf16 %v221_v13, %v220_v11  ;;  %v358_v18 = vld [vmem:[%s1584_s1] sm:$0xff]  ;;  %v359_v24 = vld [vmem:[%s1584_s1 + $0x8] sm:$0xff]  ;;  %s1014_s22 = sshll.u32 %s1388_s19, 7  ;;  %s916_s10 = sshll.u32 %s215_s8, 4  ;;  %s1540_s10 = int_to_ptr.vmem [resolvable:$true] %s916_s10 }
  0x3d   : > { %v1156_v17 = vpack.c.bf16 %v223_v15, %v222_v14  ;;  %1127 = vmatprep.subr.bf16.mxu0 %v1126_v7  ;;  %1079 = vmatprep.mubr.msk.f32.mxu1 %vm367_vm1, %v358_v18  ;;  %v1003_v34 = vld [vmem:[%s1586_s3] ss:$0 sm:$0xff]  ;;  %s1538_s23 = scalar_lea.hbm %s1587_s4, %s1014_s22  ;;  %s1267_s29 = scalar_lea.vmem %s1540_s10, 128 }
  0x3e   : > { %p1268_p6 = scmp.ne.s32.totalorder %s1540_s10, %s1267_s29  ;;  %s1341_s19 = smov [#allocation5]  }
  0x3f   : > { %s1271_s30 = sshll.u32 %s1341_s19, 4  ;;  %s1272_s30 = int_to_ptr.vmem [resolvable:$false] %s1271_s30 }
  0x40   : > { %1129 = vmatpush3.bf16.msra.mxu0 %v1126_v7  ;;  %p1269_p12 = pnand %p1268_p6, %p1594_p11  ;;  %s1273_s26 = scalar_lea.vmem %s1272_s30, 256 }
  0x41   : > { %1146 = vmatprep.subr.bf16.mxu0 %v1338_v32  ;;  %p1274_p8 = scmp.lt.s32.totalorder %s1540_s10, %s1272_s30  ;;  %p1275_p10 = scmp.lt.s32.totalorder %s1273_s26, %s1267_s29 }
  0x42   : > { %p1270_p13 = pneg %p1269_p12 }
  0x43   : > { %1064 = vmatmul.mubr.msk.f32.vlgmr.msra.gmra.mrb[0].mxu0 %vm228_vm0, %v217_v6  ;;  %p1276_p0 = por %p1275_p10, %p1274_p8 }
  0x44   : > { %1066 = vmatprep.mubr.msk.f32.mxu0 %vm228_vm0, %v218_v9  ;;  %1148 = vmatpush3.bf16.msra.mxu0 %v1147_v8 }
  0x45   : > { %1149 = vmatprep.subr.bf16.mxu0 %v1338_v32  ;;  %p1277_p2 = pnand %p1276_p0, %p1270_p13 }
  0x47   : > { %1067 = vmatmul.mubr.msk.f32.gmra.mrb[2].mxu0 %vm228_vm0, %v219_v10 }
  0x48   : > { %1069 = vmatprep.mubr.msk.f32.mxu0 %vm228_vm0, %v220_v11  ;;  %1151 = vmatpush3.bf16.msra.mxu0 %v1150_v12 }
  0x49   : > { %1152 = vmatprep.subr.bf16.mxu0 %v1338_v32 }
  0x4b   : > { %1070 = vmatmul.mubr.msk.f32.gmra.mrb[4].mxu0 %vm228_vm0, %v221_v13 }
  0x4c   : > { %1072 = vmatprep.mubr.msk.f32.mxu0 %vm228_vm0, %v222_v14  ;;  %1154 = vmatpush3.bf16.msra.mxu0 %v1153_v16 }
  0x4d   : > { %1155 = vmatprep.subr.bf16.mxu0 %v1338_v32 }
  0x4f   : > { %1073 = vmatmul.mubr.msk.f32.gmra.mrb[6].mxu0 %vm228_vm0, %v223_v15 }
  0x50   : > { %1119 = vmatprep.mubr.msk.f32.mxu0 %vm1339_vm2, %v1340_v33  ;;  %1157 = vmatpush3.bf16.msra.mxu0 %v1156_v17 }
 0x116   : > { %v1065_v19 = vpop.f32.mrb[0].mxu0 }
 0x117   : > { %v319_v20 = vpop.f32.mrb[1].mxu0 }
 0x118   : > { %v1130_v21 = vpack.c.bf16 %v1065_v19, %v319_v20 }
 0x11a   : > { %v1068_v22 = vpop.f32.mrb[2].mxu0  ;;  %1131 = vmatprep.subr.bf16.mxu1 %v1130_v21 }
 0x11b   : > { %v329_v23 = vpop.f32.mrb[3].mxu0  ;;  %1133 = vmatpush3.bf16.msra.mxu1 %v1130_v21 }
 0x11c   : > { %v1134_v25 = vpack.c.bf16 %v1068_v22, %v329_v23 }
 0x11e   : > { %v1071_v26 = vpop.f32.mrb[4].mxu0  ;;  %1080 = vmatmul.mubr.msk.f32.vlgmr.msra.gmra.mrb[0].mxu1 %vm367_vm1, %v359_v24  ;;  %1135 = vmatprep.subr.bf16.mxu1 %v1134_v25 }
 0x11f   : > { %v339_v27 = vpop.f32.mrb[5].mxu0  ;;  %1137 = vmatpush3.bf16.msra.mxu1 %v1134_v25  ;;  %1086 = vmatprep.mubr.msk.f32.mxu1 %vm367_vm1, %v358_v18 }
 0x120   : > { %v1138_v28 = vpack.c.bf16 %v1071_v26, %v339_v27 }
 0x122   : > { %v1074_v29 = vpop.f32.mrb[6].mxu0  ;;  %1087 = vmatmul.mubr.msk.f32.vlgmr.msra.gmra.mrb[2].mxu1 %vm367_vm1, %v359_v24  ;;  %1139 = vmatprep.subr.bf16.mxu1 %v1138_v28 }
 0x123   : > { %v349_v30 = vpop.f32.mrb[7].mxu0  ;;  %1141 = vmatpush3.bf16.msra.mxu1 %v1138_v28  ;;  %1093 = vmatprep.mubr.msk.f32.mxu1 %vm367_vm1, %v358_v18 }
 0x124   : > { %v1142_v31 = vpack.c.bf16 %v1074_v29, %v349_v30 }
 0x126   : > { %1094 = vmatmul.mubr.msk.f32.vlgmr.msra.gmra.mrb[4].mxu1 %vm367_vm1, %v359_v24  ;;  %1143 = vmatprep.subr.bf16.mxu1 %v1142_v31 }
 0x127   : > { %1145 = vmatpush3.bf16.msra.mxu1 %v1142_v31  ;;  %1100 = vmatprep.mubr.msk.f32.mxu1 %vm367_vm1, %v358_v18 }
 0x12a   : > { %1101 = vmatmul.mubr.msk.f32.vlgmr.msra.gmra.mrb[6].mxu1 %vm367_vm1, %v359_v24 }
 0x1f1   : > { %v1081_v35 = vpop.f32.mrb[0].mxu1 }
 0x1f2   : > { %v446_v36 = vadd.f32 %v1081_v35, %v1003_v34  ;;  %v440_v37 = vpop.f32.mrb[1].mxu1 }
 0x1f3   : > { %v441_v38 = vadd.f32 %v1003_v34, %v440_v37 }
 0x1f4   : > { %v451_v39 = vsel %vm449_vm3, %v446_v36, -inf }
 0x1f5   : > { %v450_v40 = vsel %vm449_vm3, %v441_v38, -inf  ;;  %v1088_v41 = vpop.f32.mrb[2].mxu1 }
 0x1f6   : > { %v452_v42 = vmax.f32 %v450_v40, %v451_v39  ;;  %v549_v43 = vadd.f32 %v1088_v41, %v1003_v34  ;;  %v543_v44 = vpop.f32.mrb[3].mxu1 }
 0x1f7   : > { %v544_v45 = vadd.f32 %v1003_v34, %v543_v44 }
 0x1f8   : > { %v453_v46 = vrot.slane %v452_v42, 4  ;;  %v553_v47 = vsel %vm449_vm3, %v549_v43, -inf }
 0x1f9   : > { %v552_v48 = vsel %vm449_vm3, %v544_v45, -inf  ;;  %v1095_v49 = vpop.f32.mrb[4].mxu1 }
 0x1fa   : > { %v454_v50 = vmax.f32 %v452_v42, %v453_v46  ;;  %v554_v51 = vmax.f32 %v552_v48, %v553_v47  ;;  %v651_v52 = vadd.f32 %v1095_v49, %v1003_v34  ;;  %v645_v53 = vpop.f32.mrb[5].mxu1 }
 0x1fb   : > { %v646_v54 = vadd.f32 %v1003_v34, %v645_v53 }
 0x1fc   : > { %v455_v55 = vrot.slane %v454_v50, 2  ;;  %v555_v56 = vrot.slane %v554_v51, 4  ;;  %v655_v57 = vsel %vm449_vm3, %v651_v52, -inf }
 0x1fd   : > { %v654_v58 = vsel %vm449_vm3, %v646_v54, -inf  ;;  %v1102_v59 = vpop.f32.mrb[6].mxu1 }
 0x1fe   : > { %v456_v60 = vmax.f32 %v454_v50, %v455_v55  ;;  %v556_v61 = vmax.f32 %v554_v51, %v555_v56  ;;  %v656_v62 = vmax.f32 %v654_v58, %v655_v57  ;;  %v753_v63 = vadd.f32 %v1102_v59, %v1003_v34  ;;  %v747_v0 = vpop.f32.mrb[7].mxu1 }
 0x1ff   : > { %v748_v1 = vadd.f32 %v1003_v34, %v747_v0 }
 0x200   : > { %v457_v2 = vrot.slane %v456_v60, 1  ;;  %v557_v3 = vrot.slane %v556_v61, 2  ;;  %v657_v4 = vrot.slane %v656_v62, 4  ;;  %v757_v5 = vsel %vm449_vm3, %v753_v63, -inf }
 0x201   : > { %v756_v6 = vsel %vm449_vm3, %v748_v1, -inf }
 0x202   : > { %v458_v7 = vmax.f32 %v456_v60, %v457_v2  ;;  %v558_v8 = vmax.f32 %v556_v61, %v557_v3  ;;  %v658_v9 = vmax.f32 %v656_v62, %v657_v4  ;;  %v758_v10 = vmax.f32 %v756_v6, %v757_v5 }
 0x204   : > { %v459_v11 = vsub.f32 %v441_v38, %v458_v7  ;;  %v460_v12 = vsub.f32 %v446_v36, %v458_v7  ;;  %v559_v13 = vrot.slane %v558_v8, 1  ;;  %v659_v14 = vrot.slane %v658_v9, 2 }
 0x205   : > { %v759_v15 = vrot.slane %v758_v10, 4 }
 0x206   : > { %v461_v16 = vmul.f32 1.442695, %v459_v11  ;;  %v463_v17 = vmul.f32 1.442695, %v460_v12  ;;  %v560_v18 = vmax.f32 %v558_v8, %v559_v13  ;;  %v660_v19 = vmax.f32 %v658_v9, %v659_v14 }
 0x207   : > { %v760_v20 = vmax.f32 %v758_v10, %v759_v15 }
 0x208   : > { %1209 = vpow2.f32 %v461_v16  ;;  %v561_v21 = vsub.f32 %v544_v45, %v560_v18  ;;  %v562_v22 = vsub.f32 %v549_v43, %v560_v18  ;;  %v661_v23 = vrot.slane %v660_v19, 1 }
 0x209   : > { %1211 = vpow2.f32 %v463_v17  ;;  %v761_v24 = vrot.slane %v760_v20, 2 }
 0x20a   : > { %v563_v25 = vmul.f32 1.442695, %v561_v21  ;;  %v565_v26 = vmul.f32 1.442695, %v562_v22  ;;  %v662_v27 = vmax.f32 %v660_v19, %v661_v23 }
 0x20b   : > { %v762_v28 = vmax.f32 %v760_v20, %v761_v24 }
 0x20c   : > { %1213 = vpow2.f32 %v563_v25  ;;  %v663_v29 = vsub.f32 %v646_v54, %v662_v27  ;;  %v664_v30 = vsub.f32 %v651_v52, %v662_v27 }
 0x20d   : > { %1215 = vpow2.f32 %v565_v26  ;;  %v763_v31 = vrot.slane %v762_v28, 1 }
 0x20e   : > { %v665_v32 = vmul.f32 1.442695, %v663_v29  ;;  %v667_v33 = vmul.f32 1.442695, %v664_v30 }
 0x20f   : > { %v764_v34 = vmax.f32 %v762_v28, %v763_v31 }
 0x210   : > { %1217 = vpow2.f32 %v665_v32 }
 0x211   : > { %1219 = vpow2.f32 %v667_v33  ;;  %v765_v35 = vsub.f32 %v748_v1, %v764_v34  ;;  %v766_v36 = vsub.f32 %v753_v63, %v764_v34 }
 0x212   : > { %v1210_v37 = vpop.eup %1209 }
 0x213   : > { %v1212_v38 = vpop.eup %1211  ;;  %v465_v39 = vsel %vm449_vm3, %v1210_v37, 0.0  ;;  %v767_v40 = vmul.f32 1.442695, %v765_v35  ;;  %v769_v41 = vmul.f32 1.442695, %v766_v36 }
 0x214   : > { %v466_v42 = vsel %vm449_vm3, %v1212_v38, 0.0 }
 0x215   : > { %v467_v43 = vadd.f32 %v466_v42, %v465_v39  ;;  %1221 = vpow2.f32 %v767_v40 }
 0x216   : > { %v1214_v44 = vpop.eup %1213  ;;  %1223 = vpow2.f32 %v769_v41 }
 0x217   : > { %v1216_v45 = vpop.eup %1215  ;;  %v567_v46 = vsel %vm449_vm3, %v1214_v44, 0.0  ;;  %v468_v47 = vrot.slane %v467_v43, 4 }
 0x218   : > { %v568_v48 = vsel %vm449_vm3, %v1216_v45, 0.0 }
 0x219   : > { %v569_v49 = vadd.f32 %v568_v48, %v567_v46  ;;  %v469_v50 = vadd.f32 %v468_v47, %v467_v43 }
 0x21a   : > { %v1218_v51 = vpop.eup %1217 }
 0x21b   : > { %v1220_v52 = vpop.eup %1219  ;;  %v570_v53 = vrot.slane %v569_v49, 4  ;;  %v669_v54 = vsel %vm449_vm3, %v1218_v51, 0.0  ;;  %v470_v55 = vrot.slane %v469_v50, 2 }
 0x21c   : > { %v670_v56 = vsel %vm449_vm3, %v1220_v52, 0.0 }
 0x21d   : > { %v671_v57 = vadd.f32 %v670_v56, %v669_v54  ;;  %v471_v58 = vadd.f32 %v470_v55, %v469_v50  ;;  %v571_v59 = vadd.f32 %v570_v53, %v569_v49 }
 0x21f   : > { %v1222_v60 = vpop.eup %1221  ;;  %v672_v61 = vrot.slane %v671_v57, 4  ;;  %v472_v62 = vrot.slane %v471_v58, 1  ;;  %v572_v63 = vrot.slane %v571_v59, 2 }
 0x220   : > { %v1224_v0 = vpop.eup %1223  ;;  %v771_v1 = vsel %vm449_vm3, %v1222_v60, 0.0 }
 0x221   : > { %v772_v2 = vsel %vm449_vm3, %v1224_v0, 0.0  ;;  %v473_v3 = vadd.f32 %v472_v62, %v471_v58  ;;  %v573_v4 = vadd.f32 %v572_v63, %v571_v59  ;;  %v673_v5 = vadd.f32 %v672_v61, %v671_v57 }
 0x222   : > { %v773_v6 = vadd.f32 %v772_v2, %v771_v1 }
 0x223   : > { %1225 = vrcp.f32 %v473_v3  ;;  %v574_v7 = vrot.slane %v573_v4, 1  ;;  %v674_v8 = vrot.slane %v673_v5, 2 }
 0x224   : > { %v774_v9 = vrot.slane %v773_v6, 4 }
 0x225   : > { %v575_v10 = vadd.f32 %v574_v7, %v573_v4  ;;  %v675_v11 = vadd.f32 %v674_v8, %v673_v5 }
 0x226   : > { %v775_v12 = vadd.f32 %v774_v9, %v773_v6 }
 0x227   : > { %1227 = vrcp.f32 %v575_v10  ;;  %v676_v13 = vrot.slane %v675_v11, 1 }
 0x228   : > { %v776_v14 = vrot.slane %v775_v12, 2 }
 0x229   : > { %v677_v15 = vadd.f32 %v676_v13, %v675_v11 }
 0x22a   : > { %v777_v16 = vadd.f32 %v776_v14, %v775_v12 }
 0x22b   : > { %1229 = vrcp.f32 %v677_v15 }
 0x22c   : > { %v778_v17 = vrot.slane %v777_v16, 1 }
 0x22d   : > { %v1226_v18 = vpop.eup %1225 }
 0x22e   : > { %v475_v19 = vmul.f32 %v1226_v18, %v1210_v37  ;;  %v476_v20 = vmul.f32 %v1226_v18, %v1212_v38  ;;  %v779_v21 = vadd.f32 %v778_v17, %v777_v16 }
 0x230   : > { %783 = vxpose.xlu0.b32.start [1/8] (short) (narrow) %v475_v19, 8  ;;  %1231 = vrcp.f32 %v779_v21 }
 0x231   : > { %v1228_v22 = vpop.eup %1227 }
 0x232   : > { %v577_v23 = vmul.f32 %v1228_v22, %v1214_v44  ;;  %v578_v24 = vmul.f32 %v1228_v22, %v1216_v45 }
 0x234   : > { %784 = vxpose.xlu0.b32.cont [2/8] (short) (narrow) %v476_v20, 8 }
 0x235   : > { %v1230_v25 = vpop.eup %1229 }
 0x236   : > { %v679_v26 = vmul.f32 %v1230_v25, %v1218_v51  ;;  %v680_v27 = vmul.f32 %v1230_v25, %v1220_v52 }
 0x238   : > { %785 = vxpose.xlu0.b32.cont [3/8] (short) (narrow) %v577_v23, 8 }
 0x23a   : > { %v1232_v28 = vpop.eup %1231 }
 0x23b   : > { %v781_v29 = vmul.f32 %v1232_v28, %v1222_v60  ;;  %v782_v30 = vmul.f32 %v1232_v28, %v1224_v0 }
 0x23c   : > { %786 = vxpose.xlu0.b32.cont [4/8] (short) (narrow) %v578_v24, 8 }
 0x240   : > { %787 = vxpose.xlu0.b32.cont [5/8] (short) (narrow) %v679_v26, 8 }
 0x244   : > { %788 = vxpose.xlu0.b32.cont [6/8] (short) (narrow) %v680_v27, 8 }
 0x248   : > { %789 = vxpose.xlu0.b32.cont [7/8] (short) (narrow) %v781_v29, 8 }
 0x24c   : > { %790 = vxpose.xlu0.b32.end [8/8] (short) (narrow) %v782_v30, 8 }
 0x2b0   : > { %v799_v31 = vpop.trf.xlu0 }
 0x2b1   : > { %1120 = vmatmul.mubr.msk.f32.vlgmr.msra.gmra.mrb[8].mxu0 %vm815_vm4, %v799_v31 }
 0x384   : > { %v885_v32 = vpop.f32.mrb[8].mxu0 }
 0x385   : > { %v889_v33 = vmul.f32 0.125, %v885_v32  ;;  %v1121_v34 = vpop.f32.mrb[9].mxu0 }
 0x387   : > { %v890_v35 = vmul.f32 %v889_v33, %v889_v33 }
 0x389   : > { %v891_v36 = vsel %vm228_vm0, %v890_v35, 0.0 }
 0x38a   : > { %892 = vadd.xlane.f32.xlu1 %v891_v36 }
 0x417   : > { %v893_v37 = vpop.xlane.xlu1 %892 }
 0x418   : > { %v894_v38 = vadd.f32 1.0, %v893_v37  ;;  %v898_v39 = vadd.f32 1e-08, %v893_v37 }
 0x41a   : > { %1233 = vrcp.f32 %v894_v38 }
 0x41b   : > { %1235 = vrsqrt.f32 %v898_v39 }
 0x424   : > { %v1234_v40 = vpop.eup %1233 }
 0x425   : > { %v896_v41 = vmul.f32 %v1234_v40, %v893_v37  ;;  %v1236_v43 = vpop.eup %1235 }
 0x427   : > { %v897_v42 = vmul.f32 %v896_v41, %v889_v33 }
 0x429   : > { %v900_v44 = vmul.f32 %v1236_v43, %v897_v42 }
 0x42b   : > { %901 = vst.msk [vmem:[%s215_s8] sm:$0xff] %vm228_vm0, %v900_v44 }
 0x42c   : > { %1280 = shalt.err (!%p1277_p2)
}
 0x42d   : > { %s1281_s13 = scalar_lea.hbm %s1538_s23, 128  ;;  %s1285_s7 = scalar_lea.hbm %s1587_s4, 256 }
 0x42e   : > { %p1282_p4 = scmp.ne.s32.totalorder %s1538_s23, %s1281_s13  ;;  %p1286_p9 = scmp.lt.u32.totalorder %s1538_s23, %s1587_s4 }
 0x42f   : > { %p1287_p1 = scmp.lt.u32.totalorder %s1285_s7, %s1281_s13  ;;  %p1289_p6 = scmp.lt.u32.totalorder %s1281_s13, %s1538_s23 }
 0x430   : > { %p1283_p5 = pnand %p1282_p4, %p1594_p11 }
 0x431   : > { %p1288_p3 = por %p1287_p1, %p1286_p9 }
 0x432   : > { %p1284_p7 = pneg %p1283_p5 }
 0x433   : > { %p1290_p12 = por %p1289_p6, %p1288_p3 }
 0x435   : > { %p1291_p13 = pnand %p1290_p12, %p1284_p7 }
 0x437   : > { %1294 = shalt.err (!%p1291_p13)
}
 0x438   : > { %1160 = dma.vmem_to_hbm [thread:$0]  (%p1594_p11), %s1540_s10, 128, %s1538_s23, %s903_s25  }
 0x439 PF: > { %s928_s20 = sand.u32 1, %s1321_s15   ;;  %p1595_p8 = scmp.ne.s32.totalorder %s1592_s28, 0 }
 0x43a   : > { %p1596_p10 = scmp.ge.s32.totalorder %s1333_s18, 2  ;;  %s929_s22 = scalar_lea.sflag [#allocation4], %s928_s20 }
 0x43c   : > { %p1167_p0 = pnand %p1596_p10, %p1595_p8 }
 0x43e   : > { %1316 = dma.done.wait (!%p1167_p0), %s929_s22, 128  }
 0x43f   : > { %1318 = vsyncadd (!%p1167_p0), %s929_s22, 4294967168  ;;  %p17_p2 = scmp.ge.s32.totalorder %s1392_s21, 4   ;;  %s1597_s15 = smov %s1325_s16 }
 0x440   : > { %s1598_s16 = smov %s1329_s17  ;;  %s1599_s17 = smov %s1404_s24 }
 0x441   : > { %s1600_s18 = smov %s1392_s21  ;;  %19 = sbr.rel (!%p17_p2) target bundleno = 5 (0x5), region = 81 }
 0x448   :  { %934 = vsyncpa [#allocation3], 1 }
 0x449   :  { %936 = vsyncpa [#allocation3 + $0x1], 1 }
 0x44a   :  { %937 = vsyncpa [#allocation4], 1 }
 0x44b   :  { %939 = vsyncpa [#allocation4 + $0x1], 1 }

</bundles_post_ra>
